<compile_context>
chip_gen: v5e
topology: v5e:2x2
jax: 0.10.0
libtpu: 0.0.40
codegen_flags: <defaults>
</compile_context>

<pallas_src>
import functools

import jax
import jax.numpy as jnp
import numpy as np
from jax.experimental import pallas as pl
from jax.experimental.pallas import tpu as pltpu


def _ls_ce_kernel(logits_ref, label_ref, out_ref, *, lb_pos, lb_neg, lb_ignore,
                  n_cls, hw_total, tile_hw):
    j = pl.program_id(0)                      # pixel-chunk index

    x = logits_ref[0]                         # (C, T)  classes x pixels, native dtype
    lbl = label_ref[0]                        # (1, T)  int32

    # Mask out both ignore-labelled pixels and out-of-bounds tail pixels of the
    # last (partial) block.  OOB logits/labels are garbage but stay confined to
    # their own lane columns and are zeroed out below.
    col = j * tile_hw + jax.lax.broadcasted_iota(jnp.int32, lbl.shape, 1)
    valid = (lbl != lb_ignore) & (col < hw_total)                      # (1, T)
    lbl_safe = jnp.where(valid, lbl, 0)

    # Softmax pieces over the class (sublane) axis; max & raw sums run in the
    # input dtype (bf16 VALU on v6e/v7x), exp/lse and accumulation in f32.
    m = jnp.max(x, axis=0, keepdims=True)                              # (1, T)
    mf = m.astype(jnp.float32)
    shifted = x.astype(jnp.float32) - mf                               # (C, T) f32
    lse = jnp.log(jnp.sum(jnp.exp(shifted), axis=0, keepdims=True))    # (1, T)

    sum_x = jnp.sum(x, axis=0, keepdims=True, dtype=jnp.float32)       # (1, T)
    cls = jax.lax.broadcasted_iota(jnp.int32, x.shape, 0)              # (C, T)
    x_y = jnp.sum(jnp.where(cls == lbl_safe, x, jnp.zeros((), x.dtype)),
                  axis=0, keepdims=True, dtype=jnp.float32)            # (1, T)

    shift_y = x_y - mf
    sum_shift = sum_x - float(n_cls) * mf

    # folded label-smoothing:  sum_c logs*smooth
    #  = (lb_pos-lb_neg)*logs[y] + lb_neg*sum_c logs
    #  = (lb_pos-lb_neg)*shift_y + lb_neg*sum_shift - lse*(lb_pos+(C-1)*lb_neg)
    coef = lb_pos + (n_cls - 1) * lb_neg
    per_px = (lb_pos - lb_neg) * shift_y + lb_neg * sum_shift - coef * lse
    per_px = jnp.where(valid, per_px, 0.0)                             # (1, T)

    num = jnp.sum(per_px)                       # scalar partial numerator
    cnt = jnp.sum(valid.astype(jnp.float32))    # scalar partial valid count

    lane = jax.lax.broadcasted_iota(jnp.int32, out_ref.shape, out_ref.ndim - 1)
    # lane 0 = loss numerator partial, lane 1 = valid-pixel partial count
    out_ref[...] = jnp.where(lane == 0, num, jnp.where(lane == 1, cnt, 0.0))


def _pick_vmem_limit_bytes():
    """Generation-aware VMEM limit (safe on v7x's 64 MiB, larger on v5e/v6e)."""
    phys = None
    try:
        phys = getattr(pltpu.get_tpu_info(), "vmem_capacity_bytes", None)
    except Exception:
        phys = None
    if not phys:
        phys = 64 * 1024 * 1024          # conservative default = v7x size
    return int(min(phys * 3 // 4, 96 * 1024 * 1024))


def label_smooth_softmax_ce(logits, label, *, lb_pos=0.9, lb_neg=0.005,
                            lb_ignore=255, max_tile_hw=65536):
    """logits: (N, C, H, W); label: (N, H, W) int.  Returns scalar mean loss."""
    N, C, H, W = logits.shape
    HW = H * W

    # Free (no-copy) views in the native NCHW layout — no padding copies.
    x = logits.reshape(N, C, HW)
    lbl = label.reshape(N, 1, HW).astype(jnp.int32)

    # Tile sizing: account for the whole per-step VMEM working set, not just
    # the double-buffered inputs:
    #   2 logits buffers (C*T*itemsize each) + 2 label buffers (T*4 each)
    #   + ~5 live (C, T) f32/int32 temps + a handful of (1, T) f32 vectors.
    itemsize = jnp.dtype(logits.dtype).itemsize
    vmem_limit = _pick_vmem_limit_bytes()
    budget = vmem_limit // 2                       # headroom for compiler/spills
    per_lane_bytes = 2 * C * itemsize + 2 * 4 + 5 * C * 4 + 48
    t = (budget // per_lane_bytes) // 128 * 128
    hw_cap = -(-HW // 128) * 128
    tile_hw = max(128, min(t, max_tile_hw, hw_cap))

    if per_lane_bytes * tile_hw > vmem_limit:
        # TODO(synk): class-chunked (online-softmax over C blocks) path for very
        # large class counts; current single-pass layout needs C*tile in VMEM.
        raise ValueError(
            f"Class count C={C} too large for single-pass VMEM layout "
            f"(needs {per_lane_bytes * tile_hw} bytes > limit {vmem_limit}).")

    g_hw = -(-HW // tile_hw)                       # ceil; last block may be partial

    kernel = functools.partial(
        _ls_ce_kernel, lb_pos=float(lb_pos), lb_neg=float(lb_neg),
        lb_ignore=int(lb_ignore), n_cls=C, hw_total=HW, tile_hw=tile_hw)

    cost = pl.CostEstimate(
        flops=int(10 * N * C * HW),
        transcendentals=int(N * C * HW),
        bytes_accessed=int(N * C * HW * itemsize + N * HW * 4
                           + g_hw * N * 128 * 4),
    )

    partial_sums = pl.pallas_call(
        kernel,
        out_shape=jax.ShapeDtypeStruct((g_hw, N, 1, 128), jnp.float32),
        grid_spec=pltpu.PrefetchScalarGridSpec(
            num_scalar_prefetch=0,
            grid=(g_hw, N),
            in_specs=[
                pl.BlockSpec((1, C, tile_hw), lambda j, n: (n, 0, j)),
                pl.BlockSpec((1, 1, tile_hw), lambda j, n: (n, 0, j)),
            ],
            out_specs=pl.BlockSpec((1, 1, 1, 128), lambda j, n: (j, n, 0, 0)),
        ),
        compiler_params=pltpu.CompilerParams(
            # Fully independent per-(chunk, batch) partials: both axes parallel,
            # so v7x megacore can shard either axis.
            dimension_semantics=("parallel", "parallel"),
            vmem_limit_bytes=vmem_limit,
        ),
        cost_estimate=cost,
    )(x, lbl)

    num = jnp.sum(partial_sums[:, :, 0, 0])
    cnt = jnp.sum(partial_sums[:, :, 0, 1])
    # reduction == 'mean': loss = -sum(logs * smoothed_label) / n_valid
    # (NaN when no valid pixels, matching the reference module's behaviour.)
    return -num / cnt


def _reference(logits, label, lb_pos=0.9, lb_neg=0.005, lb_ignore=255):
    C = logits.shape[1]
    logs = jax.nn.log_softmax(logits.astype(jnp.float32), axis=1)
    valid = (label != lb_ignore)
    n_valid = jnp.sum(valid).astype(jnp.float32)
    lbl = jnp.where(valid, label, 0)
    one_hot = jax.nn.one_hot(lbl, C, axis=1, dtype=jnp.float32)   # (N, C, H, W)
    smooth = lb_pos * one_hot + lb_neg * (1.0 - one_hot)
    smooth = smooth * valid[:, None, :, :].astype(jnp.float32)
    return -jnp.sum(logs * smooth) / n_valid


if __name__ == "__main__":
    key = jax.random.PRNGKey(0)
    k1, k2, k3 = jax.random.split(key, 3)

    N, C, H, W = 2, 4, 16, 16
    logits = jax.random.normal(k1, (N, C, H, W), dtype=jnp.float32)
    label = jax.random.randint(k2, (N, H, W), 0, C, dtype=jnp.int32)
    # sprinkle in some ignore (255) pixels
    ignore_mask = jax.random.bernoulli(k3, 0.1, (N, H, W))
    label = jnp.where(ignore_mask, jnp.int32(255), label)

    loss = label_smooth_softmax_ce(logits, label)
    loss = jax.block_until_ready(loss)

    ref = jax.block_until_ready(_reference(logits, label))
    np.testing.assert_allclose(np.asarray(loss), np.asarray(ref),
                               rtol=1e-5, atol=1e-5)

    # TODO(synk): reduction='none' variant (per-pixel loss map) not wired up;
    # module default reduction='mean' is implemented.
    print("KERNEL_OK")
</pallas_src>

<mosaic_0001>
module attributes {stable_mosaic.version = 11 : i64} {
  func.func @_ls_ce_kernel(%arg0: i32, %arg1: i32, %arg2: memref<1x4x256xf32, #tpu.memory_space<vmem>>, %arg3: memref<1x1x256xi32, #tpu.memory_space<vmem>>, %arg4: memref<1x1x1x128xf32, #tpu.memory_space<vmem>>) attributes {dimension_semantics = [#tpu.dimension_semantics<parallel>, #tpu.dimension_semantics<parallel>], iteration_bounds = array<i64: 1, 2>, scalar_prefetch = 0 : i64, scratch_operands = 0 : i64, tpu.core_type = #tpu.core_type<tc>, window_params = [{transform_indices = @transform_0, window_bounds = array<i64: 1, 4, 256>}, {transform_indices = @transform_1, window_bounds = array<i64: 1, 1, 256>}, {transform_indices = @transform_2, window_bounds = array<i64: 1, 1, 1, 128>}]} {
    %c0 = arith.constant 0 : index
    %c0_0 = arith.constant 0 : index
    %c0_1 = arith.constant 0 : index
    %0 = vector.load %arg2[%c0, %c0_0, %c0_1] : memref<1x4x256xf32, #tpu.memory_space<vmem>>, vector<1x4x256xf32>
    %1 = vector.shape_cast %0 : vector<1x4x256xf32> to vector<4x256xf32>
    %c0_2 = arith.constant 0 : index
    %c0_3 = arith.constant 0 : index
    %c0_4 = arith.constant 0 : index
    %2 = vector.load %arg3[%c0_2, %c0_3, %c0_4] : memref<1x1x256xi32, #tpu.memory_space<vmem>>, vector<1x1x256xi32>
    %3 = vector.shape_cast %2 : vector<1x1x256xi32> to vector<1x256xi32>
    %c256_i32 = arith.constant 256 : i32
    %4 = arith.muli %arg0, %c256_i32 : i32
    %5 = tpu.iota {dimensions = array<i32: 1>} : vector<1x256xi32>
    %6 = vector.broadcast %4 : i32 to vector<1x256xi32>
    %7 = arith.addi %6, %5 : vector<1x256xi32>
    %c255_i32 = arith.constant 255 : i32
    %8 = vector.broadcast %c255_i32 : i32 to vector<1x256xi32>
    %9 = arith.cmpi ne, %3, %8 : vector<1x256xi32>
    %c256_i32_5 = arith.constant 256 : i32
    %10 = vector.broadcast %c256_i32_5 : i32 to vector<1x256xi32>
    %11 = arith.cmpi slt, %7, %10 : vector<1x256xi32>
    %12 = arith.andi %9, %11 : vector<1x256xi1>
    %c0_i32 = arith.constant 0 : i32
    %13 = vector.broadcast %c0_i32 : i32 to vector<1x256xi32>
    %14 = arith.select %12, %3, %13 : vector<1x256xi1>, vector<1x256xi32>
    %cst = arith.constant dense<0xFF800000> : vector<256xf32>
    %15 = vector.multi_reduction <maximumf>, %1, %cst [0] : vector<4x256xf32> to vector<256xf32>
    %16 = vector.shape_cast %15 : vector<256xf32> to vector<1x256xf32>
    %17 = vector.broadcast %16 : vector<1x256xf32> to vector<4x256xf32>
    %18 = arith.subf %1, %17 : vector<4x256xf32>
    %19 = math.exp %18 : vector<4x256xf32>
    %cst_6 = arith.constant dense<0.000000e+00> : vector<256xf32>
    %20 = vector.multi_reduction <add>, %19, %cst_6 [0] : vector<4x256xf32> to vector<256xf32>
    %21 = vector.shape_cast %20 : vector<256xf32> to vector<1x256xf32>
    %22 = math.log %21 : vector<1x256xf32>
    %cst_7 = arith.constant dense<0.000000e+00> : vector<256xf32>
    %23 = vector.multi_reduction <add>, %1, %cst_7 [0] : vector<4x256xf32> to vector<256xf32>
    %24 = vector.shape_cast %23 : vector<256xf32> to vector<1x256xf32>
    %25 = tpu.iota {dimensions = array<i32: 0>} : vector<4x256xi32>
    %26 = vector.broadcast %14 : vector<1x256xi32> to vector<4x256xi32>
    %27 = arith.cmpi eq, %25, %26 : vector<4x256xi32>
    %cst_8 = arith.constant 0.000000e+00 : f32
    %28 = vector.broadcast %cst_8 : f32 to vector<4x256xf32>
    %29 = arith.select %27, %1, %28 : vector<4x256xi1>, vector<4x256xf32>
    %cst_9 = arith.constant dense<0.000000e+00> : vector<256xf32>
    %30 = vector.multi_reduction <add>, %29, %cst_9 [0] : vector<4x256xf32> to vector<256xf32>
    %31 = vector.shape_cast %30 : vector<256xf32> to vector<1x256xf32>
    %32 = arith.subf %31, %16 : vector<1x256xf32>
    %cst_10 = arith.constant 4.000000e+00 : f32
    %33 = vector.broadcast %cst_10 : f32 to vector<1x256xf32>
    %34 = arith.mulf %33, %16 : vector<1x256xf32>
    %35 = arith.subf %24, %34 : vector<1x256xf32>
    %cst_11 = arith.constant 0.89499998 : f32
    %36 = vector.broadcast %cst_11 : f32 to vector<1x256xf32>
    %37 = arith.mulf %36, %32 : vector<1x256xf32>
    %cst_12 = arith.constant 5.000000e-03 : f32
    %38 = vector.broadcast %cst_12 : f32 to vector<1x256xf32>
    %39 = arith.mulf %38, %35 : vector<1x256xf32>
    %40 = arith.addf %37, %39 : vector<1x256xf32>
    %cst_13 = arith.constant 9.150000e-01 : f32
    %41 = vector.broadcast %cst_13 : f32 to vector<1x256xf32>
    %42 = arith.mulf %41, %22 : vector<1x256xf32>
    %43 = arith.subf %40, %42 : vector<1x256xf32>
    %cst_14 = arith.constant 0.000000e+00 : f32
    %44 = vector.broadcast %cst_14 : f32 to vector<1x256xf32>
    %45 = arith.select %12, %43, %44 : vector<1x256xi1>, vector<1x256xf32>
    %46 = vector.shape_cast %45 : vector<1x256xf32> to vector<1x1x256xf32>
    %cst_15 = arith.constant dense<0.000000e+00> : vector<1xf32>
    %47 = vector.multi_reduction <add>, %46, %cst_15 [1, 2] : vector<1x1x256xf32> to vector<1xf32>
    %48 = vector.shape_cast %47 : vector<1xf32> to vector<1x1x1xf32>
    %49 = vector.extract %48[0, 0, 0] : f32 from vector<1x1x1xf32>
    %50 = arith.extui %12 : vector<1x256xi1> to vector<1x256xi32>
    %51 = arith.sitofp %50 : vector<1x256xi32> to vector<1x256xf32>
    %52 = vector.shape_cast %51 : vector<1x256xf32> to vector<1x1x256xf32>
    %cst_16 = arith.constant dense<0.000000e+00> : vector<1xf32>
    %53 = vector.multi_reduction <add>, %52, %cst_16 [1, 2] : vector<1x1x256xf32> to vector<1xf32>
    %54 = vector.shape_cast %53 : vector<1xf32> to vector<1x1x1xf32>
    %55 = vector.extract %54[0, 0, 0] : f32 from vector<1x1x1xf32>
    %56 = tpu.iota {dimensions = array<i32: 3>} : vector<1x1x1x128xi32>
    %c0_i32_17 = arith.constant 0 : i32
    %57 = vector.broadcast %c0_i32_17 : i32 to vector<1x1x1x128xi32>
    %58 = arith.cmpi eq, %56, %57 : vector<1x1x1x128xi32>
    %c1_i32 = arith.constant 1 : i32
    %59 = vector.broadcast %c1_i32 : i32 to vector<1x1x1x128xi32>
    %60 = arith.cmpi eq, %56, %59 : vector<1x1x1x128xi32>
    %cst_18 = arith.constant 0.000000e+00 : f32
    %61 = vector.broadcast %55 : f32 to vector<1x1x1x128xf32>
    %62 = vector.broadcast %cst_18 : f32 to vector<1x1x1x128xf32>
    %63 = arith.select %60, %61, %62 : vector<1x1x1x128xi1>, vector<1x1x1x128xf32>
    %64 = vector.broadcast %49 : f32 to vector<1x1x1x128xf32>
    %65 = arith.select %58, %64, %63 : vector<1x1x1x128xi1>, vector<1x1x1x128xf32>
    %c0_19 = arith.constant 0 : index
    %c0_20 = arith.constant 0 : index
    %c0_21 = arith.constant 0 : index
    %c0_22 = arith.constant 0 : index
    %66 = vector.load %arg4[%c0_19, %c0_20, %c0_21, %c0_22] : memref<1x1x1x128xf32, #tpu.memory_space<vmem>>, vector<1x1x1x128xf32>
    tpu.vector_store %arg4[%c0_19, %c0_20, %c0_21, %c0_22], %65 {strides = array<i32>} : memref<1x1x1x128xf32, #tpu.memory_space<vmem>>, vector<1x1x1x128xf32>,
    return
  }
  func.func @transform_0(%arg0: i32, %arg1: i32) -> (i32, i32, i32) {
    %c0_i32 = arith.constant 0 : i32
    %c0_i32_0 = arith.constant 0 : i32
    return %arg1, %c0_i32, %arg0 : i32, i32, i32
  }
  func.func @transform_1(%arg0: i32, %arg1: i32) -> (i32, i32, i32) {
    %c0_i32 = arith.constant 0 : i32
    %c0_i32_0 = arith.constant 0 : i32
    return %arg1, %c0_i32, %arg0 : i32, i32, i32
  }
  func.func @transform_2(%arg0: i32, %arg1: i32) -> (i32, i32, i32, i32) {
    %c0_i32 = arith.constant 0 : i32
    %c0_i32_0 = arith.constant 0 : i32
    %c0_i32_1 = arith.constant 0 : i32
    return %arg0, %arg1, %c0_i32, %c0_i32_0 : i32, i32, i32, i32
  }
}

</mosaic_0001>

<bundles_post_ra>
// kernel: tpu_custom_call.1
= control target key start
LH: loop header
LB: loop body
LE: loop exit
PB: predicated region body
PF: predicated region fallthrough
CT: control target
= control target key end

     0   :  { %7 = vsyncpa [#allocation3], 0  ;;  %s966_s0 = inlined_call_operand.hbm [shape: f32[2,4,256], index: 0, kind: input, shape index: {}]   ;;  %s967_s1 = inlined_call_operand.hbm [shape: s32[2,1,256], index: 1, kind: input, shape index: {}]   ;;  %s968_s2 = inlined_call_operand.hbm [shape: f32[1,2,1,128], index: 2, kind: output, shape index: {}]  }
   0x1   :  { %9 = vsyncpa [#allocation3 + $0x1], 0 }
   0x2   :  { %10 = vsyncpa [#allocation6], 0 }
   0x3   :  { %12 = vsyncpa [#allocation6 + $0x1], 0 }
   0x4   :  { %13 = vsyncpa [#allocation4], 0 }
   0x5   :  { %15 = vsyncpa [#allocation4 + $0x1], 0  ;;  %s787_s9 = smov 0   ;;  %s789_s10 = smov 0  }
   0x6   :  { %s791_s11 = smov 0   ;;  %s793_s12 = smov 0  }
   0x7   :  { %s795_s13 = smov 0   ;;  %s797_s14 = smov 0  }
   0x8 LB: > { %s527_s15 = sadd.s32 4294967295, %s768_s14   ;;  %s528_s16 = sadd.s32 4294967294, %s768_s14   ;;  %s768_s14 = sphi %s797_s14, %s21_s14   ;;  %s764_s13 = sphi %s795_s13, %s980_s13   ;;  %s760_s12 = sphi %s793_s12, %s979_s12   ;;  %s756_s11 = sphi %s791_s11, %s978_s11   ;;  %s752_s10 = sphi %s789_s10, %s977_s10   ;;  %s748_s9 = sphi %s787_s9, %s976_s9  }
   0x9   : > { %s30_s17 = sadd.s32 1, %s764_s13  ;;  %s42_s18 = sadd.s32 1, %s756_s11 }
   0xa   : > { %p31_p0 = scmp.ge.s32.totalorder %s30_s17, 2  ;;  %p49_p1 = scmp.ne.s32.totalorder %s756_s11, %s752_s10 }
   0xb   : > { %p50_p2 = scmp.eq.s32.totalorder %s768_s14, 0  ;;  %p55_p3 = scmp.ne.s32.totalorder %s752_s10, %s748_s9 }
   0xc   : > { %s982_s17 = smov (%p31_p0, %s30_s17), 0  ;;  %p56_p5 = scmp.eq.s32.totalorder %s527_s15, 0 }
   0xd   : > { %p828_p4 = por %p50_p2, %p49_p1  ;;  %s37_s20 = ssub.s32 %s764_s13, %s982_s17 }
   0xe   : > { %p109_p6 = scmp.eq.s32.totalorder %s527_s15, 1  ;;  %p40_p7 = scmp.eq.s32.totalorder %s37_s20, 0 }
   0xf   : > { %p834_p8 = por %p56_p5, %p55_p3  ;;  %p115_p10 = scmp.eq.s32.totalorder %s528_s16, 1 }
  0x10   : > { %p838_p9 = por %p109_p6, %p49_p1  ;;  %p530_p12 = scmp.ge.s32.totalorder %s768_s14, 2 }
  0x11   : > { %s843_s23 = scalar_select %p40_p7, %s756_s11, %s42_s18  }
  0x12   : > { %p845_p11 = por %p115_p10, %p55_p3  ;;  %p564_p13 = scmp.lt.s32.totalorder %s768_s14, 2 }
  0x13   : > { %s135_s25 = sand.u32 1, %s756_s11   ;;  %s542_s27 = sshll.u32 %s764_s13, 3 }
  0x14   : > { %s531_s26 = sshll.u32 %s135_s25, 3  ;;  %s146_s30 = scalar_lea.hbm %s966_s0, %s542_s27 }
  0x15   : > { %s139_s3 = scalar_lea.vmem [#allocation2], %s531_s26  ;;  %s148_s5 = sshll.u32 %s146_s30, 4  ;;  %s149_s5 = int_to_ptr.hbm [resolvable:$true] %s148_s5 }
  0x16   : > { %s150_s4 = sshll.u32 %s139_s3, 4  ;;  %p858_p0 = pnand %p564_p13, %p828_p4  ;;  %s151_s4 = int_to_ptr.vmem [resolvable:$true] %s150_s4 }
  0x17   : > { %p536_p1 = scmp.ge.s32.totalorder %s768_s14, 1  ;;  %p176_p2 = scmp.lt.s32.totalorder %s768_s14, 3 }
  0x18   : > { %s136_s7 = scalar_lea.sflag [#allocation3], %s135_s25  ;;  %s534_s8 = sshll.u32 %s135_s25, 1 }
  0x19   : > { %556 = dma.hbm_to_vmem [thread:$0]  (!%p858_p0), %s149_s5, 128, %s151_s4, %s136_s7  }
  0x1a   : > { %p177_p3 = pnand %p536_p1, %p176_p2  ;;  %s535_s15 = sshll.u32 %s764_s13, 1 }
  0x1b   : > { %s167_s20 = scalar_lea.hbm %s967_s1, %s535_s15  ;;  %s161_s26 = scalar_lea.vmem [#allocation5], %s534_s8 }
  0x1c   : > { %s171_s19 = sshll.u32 %s161_s26, 4  ;;  %s169_s27 = sshll.u32 %s167_s20, 4  ;;  %s172_s19 = int_to_ptr.vmem [resolvable:$true] %s171_s19  ;;  %s170_s27 = int_to_ptr.hbm [resolvable:$true] %s169_s27 }
  0x1d   : > { %s158_s28 = scalar_lea.sflag [#allocation6], %s135_s25  ;;  %180 = sbr.rel (%p177_p3) target bundleno = 321 (0x141), region = 28 }
  0x1e   : > { %559 = dma.hbm_to_vmem [thread:$0]  (!%p858_p0), %s170_s27, 32, %s172_s19, %s158_s28  }
  0x1f   : > { %s873_s29 = sand.u32 (!%p177_p3), 1, %s752_s10  }
  0x20   : > { %s537_s30 = sshll.u32 (!%p177_p3), %s873_s29, 3  ;;  %s183_s3 = scalar_lea.sflag (!%p177_p3), [#allocation3], %s873_s29 }
  0x21   : > { %s186_s4 = scalar_lea.vmem (!%p177_p3), [#allocation2], %s537_s30 }
  0x22   : > { %735 = dma.done.wait (%p834_p8), %s183_s3, 128  }
  0x23   : > { %737 = vsyncadd (%p834_p8), %s183_s3, 4294967168  ;;  %s538_s25 = sshll.u32 %s873_s29, 1  ;;  %s193_s5 = scalar_lea.sflag [#allocation6], %s873_s29 }
  0x24   : > { %s883_s6 = scalar_lea.vmem [#allocation5], %s538_s25 }
  0x25   : > { %739 = dma.done.wait (%p834_p8), %s193_s5, 32  }
  0x26   : > { %741 = vsyncadd (%p834_p8), %s193_s5, 4294967264  ;;  %v224_v0 = vld [vmem:[%s186_s4] sm:$0xff]  ;;  %vm250_vm0 = vcmask 1043456   ;;  %v770_v22 = vmov 1   ;;  %vm239_vm1 = vcmask 1040384   ;;  %v227_v35 = vlaneseq  ;;  %s419_s8 = scalar_lea.hbm %s968_s2, %s760_s12  ;;  %s221_s15 = scalar_lea.vmem [#allocation7], %s873_s29 }
  0x27   : > { %245 = vst [vmem:[#allocation1] ss:$2 sm:$0xff] %v224_v0  ;;  %v238_v23 = vrot.slane %v770_v22, 7  ;;  %v225_v24 = vld [vmem:[%s883_s6] sm:$0x3]  ;;  %s421_s16 = sshll.u32 %s221_s15, 4  ;;  %s422_s16 = int_to_ptr.vmem [resolvable:$true] %s421_s16 }
  0x28   : > { %vm233_vm2 = vcmp.ne.s32.totalorder %v225_v24, 255  ;;  %v317_v45 = vshrl.u32 %v227_v35, 7  ;;  %s423_s20 = sshll.u32 %s419_s8, 4  ;;  %s409_s19 = scalar_lea.sflag [#allocation4], %s873_s29  ;;  %s424_s20 = int_to_ptr.hbm [resolvable:$true] %s423_s20 }
  0x29   : > { %v240_v25 = vsel %vm239_vm1, 1, %v238_v23  ;;  %s696_s27 = sshra.s32 %s424_s20, 4  ;;  %s702_s3 = scalar_lea.hbm %s968_s2, 2  ;;  %s697_s27 = int_to_ptr.hbm [resolvable:$true] %s696_s27 }
  0x2a   : > { %vm241_vm3 = vcmp.ne.s32.totalorder %v240_v25, 0  ;;  %s698_s28 = scalar_lea.hbm %s697_s27, 1  ;;  %p703_p7 = scmp.lt.s32.totalorder %s697_s27, %s968_s2 }
  0x2b   : > { %vm902_vm4 = vmand %vm233_vm2, %vm241_vm3  ;;  %p699_p4 = scmp.ne.s32.totalorder %s697_s27, %s698_s28  ;;  %p704_p8 = scmp.lt.s32.totalorder %s702_s3, %s698_s28 }
  0x2c   : > { %v243_v36 = vsel %vm902_vm4, %v225_v24, 0 }
  0x2d   : > { %v319_v46 = vperm.slane %v243_v36, 1  ;;  %v318_v50 = vperm.slane %v243_v36, 0  ;;  %p700_p5 = pnand %p699_p4, %p838_p9  ;;  %p705_p10 = por %p704_p8, %p703_p7 }
  0x2e   : > { %v246_v1 = vld.sshfl [vmem:[#allocation1] sm:$0xff pattern:$0x75316420]  ;;  %v247_v2 = vld.sshfl [vmem:[#allocation1 + $0x8] sm:$0xff pattern:$0x75316420] }
  0x2f   : > { %v251_v3 = vsel %vm250_vm0, %v246_v1, -inf  ;;  %v258_v4 = vsel %vm250_vm0, %v247_v2, -inf  ;;  %vm321_vm5 = vcmp.eq.s32.totalorder %v317_v45, %v319_v46  ;;  %vm320_vm6 = vcmp.eq.s32.totalorder %v317_v45, %v318_v50  ;;  %p701_p6 = pneg %p700_p5 }
  0x30   : > { %v252_v5 = vrot.slane %v251_v3, 4  ;;  %v259_v6 = vrot.slane %v258_v4, 4  ;;  %v771_v45 = vmov 0.0  }
  0x31   : > { %p706_p13 = pnand %p705_p10, %p701_p6 }
  0x32   : > { %v253_v7 = vmax.f32 %v251_v3, %v252_v5  ;;  %v260_v8 = vmax.f32 %v258_v4, %v259_v6 }
  0x34   : > { %v254_v9 = vrot.slane %v253_v7, 2  ;;  %v261_v10 = vrot.slane %v260_v8, 2 }
  0x36   : > { %v255_v11 = vmax.f32 %v253_v7, %v254_v9  ;;  %v262_v12 = vmax.f32 %v260_v8, %v261_v10 }
  0x38   : > { %v256_v13 = vrot.slane %v255_v11, 1  ;;  %v263_v14 = vrot.slane %v262_v12, 1 }
  0x3a   : > { %v891_v15 = vmax.f32 %v255_v11, %v256_v13  ;;  %v893_v16 = vmax.f32 %v262_v12, %v263_v14 }
  0x3c   : > { %v267_v17 = vrot.slane %v893_v16, 4  ;;  %v345_v8 = vmul.f32 4.0, %v891_v15  ;;  %v346_v9 = vmul.f32 4.0, %v893_v16 }
  0x3e   : > { %v268_v18 = vsel %vm250_vm0, %v891_v15, %v267_v17 }
  0x3f   : > { %v270_v19 = vsub.f32 %v224_v0, %v268_v18 }
  0x41   : > { %v271_v20 = vmul.f32 1.442695, %v270_v19 }
  0x43   : > { %616 = vpow2.f32 %v271_v20 }
  0x49   : > { %v617_v21 = vpop.eup %616 }
  0x4a   : > { %274 = vst [vmem:[#allocation1] ss:$2 sm:$0xff] %v617_v21 }
  0x51   : > { %v275_v26 = vld.sshfl [vmem:[#allocation1] sm:$0xff pattern:$0x75316420]  ;;  %v276_v27 = vld.sshfl [vmem:[#allocation1 + $0x8] sm:$0xff pattern:$0x75316420] }
  0x52   : > { %v279_v28 = vsel %vm250_vm0, %v275_v26, 0.0  ;;  %v286_v29 = vsel %vm250_vm0, %v276_v27, 0.0  ;;  %297 = vst [vmem:[#allocation1] ss:$2 sm:$0xff] %v224_v0 }
  0x53   : > { %v280_v30 = vrot.slane %v279_v28, 4  ;;  %v287_v31 = vrot.slane %v286_v29, 4 }
  0x55   : > { %v281_v33 = vadd.f32 %v280_v30, %v279_v28  ;;  %v288_v34 = vadd.f32 %v287_v31, %v286_v29 }
  0x57   : > { %v282_v37 = vrot.slane %v281_v33, 2  ;;  %v289_v38 = vrot.slane %v288_v34, 2 }
  0x59   : > { %v283_v39 = vadd.f32 %v282_v37, %v281_v33  ;;  %v290_v40 = vadd.f32 %v289_v38, %v288_v34  ;;  %v298_v41 = vld.sshfl [vmem:[#allocation1] sm:$0xff pattern:$0x75316420]  ;;  %v299_v42 = vld.sshfl [vmem:[#allocation1 + $0x8] sm:$0xff pattern:$0x75316420] }
  0x5a   : > { %v302_v43 = vsel %vm250_vm0, %v298_v41, 0.0  ;;  %v309_v44 = vsel %vm250_vm0, %v299_v42, 0.0  ;;  %322 = vst [vmem:[#allocation1] ss:$2 sm:$0xff] %v224_v0 }
  0x5b   : > { %v284_v47 = vrot.slane %v283_v39, 1  ;;  %v303_v48 = vrot.slane %v302_v43, 4  ;;  %v310_v49 = vrot.slane %v309_v44, 4  ;;  %v291_v51 = vrot.slane %v290_v40, 1 }
  0x5d   : > { %v304_v52 = vadd.f32 %v303_v48, %v302_v43  ;;  %v311_v53 = vadd.f32 %v310_v49, %v309_v44  ;;  %v285_v54 = vadd.f32 %v284_v47, %v283_v39  ;;  %v292_v57 = vadd.f32 %v291_v51, %v290_v40 }
  0x5f   : > { %v305_v55 = vrot.slane %v304_v52, 2  ;;  %v312_v56 = vrot.slane %v311_v53, 2  ;;  %618 = vlog2.f32 %v285_v54 }
  0x60   : > { %620 = vlog2.f32 %v292_v57 }
  0x61   : > { %v306_v58 = vadd.f32 %v305_v55, %v304_v52  ;;  %v313_v59 = vadd.f32 %v312_v56, %v311_v53  ;;  %v323_v60 = vld.sshfl [vmem:[#allocation1] sm:$0xff pattern:$0x75316420]  ;;  %v324_v61 = vld.sshfl [vmem:[#allocation1 + $0x8] sm:$0xff pattern:$0x75316420] }
  0x62   : > { %v327_v62 = vsel %vm320_vm6, %v323_v60, 0.0  ;;  %v328_v63 = vsel %vm321_vm5, %v324_v61, 0.0 }
  0x63   : > { %v329_v0 = vsel %vm250_vm0, %v327_v62, 0.0  ;;  %v336_v1 = vsel %vm250_vm0, %v328_v63, 0.0  ;;  %v307_v2 = vrot.slane %v306_v58, 1  ;;  %v314_v3 = vrot.slane %v313_v59, 1 }
  0x64   : > { %v330_v4 = vrot.slane %v329_v0, 4  ;;  %v337_v5 = vrot.slane %v336_v1, 4 }
  0x65   : > { %v308_v10 = vadd.f32 %v307_v2, %v306_v58  ;;  %v315_v11 = vadd.f32 %v314_v3, %v313_v59  ;;  %v619_v14 = vpop.eup %618 }
  0x66   : > { %v331_v6 = vadd.f32 %v330_v4, %v329_v0  ;;  %v338_v7 = vadd.f32 %v337_v5, %v336_v1  ;;  %v621_v19 = vpop.eup %620  ;;  %v294_v24 = vmul.f32 0.6931472, %v619_v14  ;;  %v228_v4 = vand.u32 127, %v227_v35 }
  0x67   : > { %v347_v22 = vsub.f32 %v308_v10, %v345_v8  ;;  %v348_v23 = vsub.f32 %v315_v11, %v346_v9  ;;  %v296_v25 = vmul.f32 0.6931472, %v621_v19 }
  0x68   : > { %v332_v12 = vrot.slane %v331_v6, 2  ;;  %v339_v13 = vrot.slane %v338_v7, 2  ;;  %v355_v33 = vmul.f32 0.915, %v294_v24  ;;  %vm402_vm7 = vcmp.eq.s32.totalorder %v228_v4, 1 }
  0x69   : > { %v351_v30 = vmul.f32 0.005, %v347_v22  ;;  %v352_v31 = vmul.f32 0.005, %v348_v23  ;;  %v356_v37 = vmul.f32 0.915, %v296_v25 }
  0x6a   : > { %v333_v17 = vadd.f32 %v332_v12, %v331_v6  ;;  %v340_v18 = vadd.f32 %v339_v13, %v338_v7  ;;  %vm401_vm8 = vcmp.eq.s32.totalorder %v228_v4, 0 }
  0x6c   : > { %v334_v20 = vrot.slane %v333_v17, 1  ;;  %v341_v21 = vrot.slane %v340_v18, 1 }
  0x6e   : > { %v335_v26 = vadd.f32 %v334_v20, %v333_v17  ;;  %v342_v27 = vadd.f32 %v341_v21, %v340_v18 }
  0x70   : > { %v343_v28 = vsub.f32 %v335_v26, %v891_v15  ;;  %v344_v29 = vsub.f32 %v342_v27, %v893_v16  ;;  %v539_v15 = vsel %vm902_vm4, 1.0, %v771_v45 }
  0x71   : > { %v385_v49 = vperm.slane %v539_v15, 0  ;;  %v386_v50 = vperm.slane %v539_v15, 1 }
  0x72   : > { %v349_v34 = vmul.f32 0.895, %v343_v28  ;;  %v350_v36 = vmul.f32 0.895, %v344_v29 }
  0x73   : > { %v389_v52 = vsel %vm239_vm1, %v385_v49, 0.0  ;;  %v390_v53 = vsel %vm239_vm1, %v386_v50, 0.0 }
  0x74   : > { %v353_v38 = vadd.f32 %v351_v30, %v349_v34  ;;  %v354_v39 = vadd.f32 %v352_v31, %v350_v36  ;;  %v391_v54 = vadd.f32 %v390_v53, %v389_v52 }
  0x76   : > { %v357_v40 = vsub.f32 %v353_v38, %v355_v33  ;;  %v358_v41 = vsub.f32 %v354_v39, %v356_v37 }
  0x78   : > { %v361_v42 = vrot.slane %v358_v41, 7 }
  0x7a   : > { %v362_v43 = vsel %vm239_vm1, %v357_v40, %v361_v42 }
  0x7b   : > { %v364_v44 = vsel %vm902_vm4, %v362_v43, 0.0 }
  0x7c   : > { %v366_v16 = vperm.slane %v364_v44, 0  ;;  %v367_v46 = vperm.slane %v364_v44, 1 }
  0x7e   : > { %v370_v47 = vsel %vm239_vm1, %v366_v16, 0.0  ;;  %v371_v48 = vsel %vm239_vm1, %v367_v46, 0.0 }
  0x7f   : > { %v372_v51 = vadd.f32 %v371_v48, %v370_v47 }
  0x81   : > { %373 = vadd.xlane.f32.xlu0 %v372_v51 }
  0x89   : > { %392 = vadd.xlane.f32.xlu0 %v391_v54 }
  0xf4   : > { %v374_v55 = vpop.xlane.xlu0 %373 }
  0xf5   : > { %v375_v56 = vrot.slane %v374_v55, 4 }
  0xf7   : > { %v376_v32 = vadd.f32 %v375_v56, %v374_v55 }
  0xf9   : > { %v377_v57 = vrot.slane %v376_v32, 2 }
  0xfb   : > { %v378_v58 = vadd.f32 %v377_v57, %v376_v32 }
  0xfc   : > { %v393_v59 = vpop.xlane.xlu0 %392 }
  0xfd   : > { %v394_v60 = vrot.slane %v393_v59, 4  ;;  %v379_v61 = vrot.slane %v378_v58, 1 }
  0xff   : > { %v395_v62 = vadd.f32 %v394_v60, %v393_v59  ;;  %v380_v63 = vadd.f32 %v379_v61, %v378_v58 }
 0x101   : > { %v396_v0 = vrot.slane %v395_v62, 2  ;;  %543 = vpush %v380_v63 }
 0x103   : > { %v397_v1 = vadd.f32 %v396_v0, %v395_v62 }
 0x105   : > { %v398_v2 = vrot.slane %v397_v1, 1 }
 0x107   : > { %v399_v3 = vadd.f32 %v398_v2, %v397_v1 }
 0x109   : > { %545 = vpush %v399_v3 }
 0x132   : > { %s544_s18 = spop %543 }
 0x133   : > { %v405_v6 = vstv %s544_s18 }
 0x13a   : > { %s546_s26 = spop %545 }
 0x13b   : > { %v403_v5 = vstv %s546_s26 }
 0x13c   : > { %v404_v7 = vsel %vm402_vm7, %v403_v5, 0.0 }
 0x13d   : > { %v406_v8 = vsel %vm401_vm8, %v405_v6, %v404_v7 }
 0x13e   : > { %407 = vst [vmem:[%s221_s15] sm:$0x1] %v406_v8 }
 0x13f   : > { %709 = shalt.err (!%p706_p13)
}
 0x140   : > { %551 = dma.vmem_to_hbm [thread:$0]  (%p838_p9), %s422_s16, 16, %s424_s20, %s409_s19  }
 0x141 PF: > { %s435_s29 = sand.u32 1, %s748_s9   ;;  %p561_p0 = pnand %p530_p12, %p845_p11 }
 0x142   : > { %s436_s5 = scalar_lea.sflag [#allocation4], %s435_s29 }
 0x143   : > { %p562_p1 = pneg %p561_p0 }
 0x145   : > { %743 = dma.done.wait (%p562_p1), %s436_s5, 16  }
 0x146   : > { %745 = vsyncadd (%p562_p1), %s436_s5, 4294967280  ;;  %s21_s14 = sadd.s32 1, %s768_s14   ;;  %s976_s9 = smov %s752_s10 }
 0x147   : > { %p18_p2 = scmp.ge.s32.totalorder %s21_s14, 4   ;;  %s977_s10 = smov %s756_s11 }
 0x148   : > { %s978_s11 = smov %s843_s23  ;;  %s979_s12 = smov %s764_s13 }
 0x149   : > { %s980_s13 = smov %s982_s17  ;;  %20 = sbr.rel (!%p18_p2) target bundleno = 8 (0x8), region = 86 }
 0x14e   :  { %441 = vsyncpa [#allocation3], 1 }
 0x14f   :  { %443 = vsyncpa [#allocation3 + $0x1], 1 }
 0x150   :  { %444 = vsyncpa [#allocation6], 1 }
 0x151   :  { %446 = vsyncpa [#allocation6 + $0x1], 1 }
 0x152   :  { %447 = vsyncpa [#allocation4], 1 }
 0x153   :  { %449 = vsyncpa [#allocation4 + $0x1], 1 }

</bundles_post_ra>
